<compile_context>
chip_gen: v5e
topology: v5e:2x2
jax: 0.10.0
libtpu: 0.0.40
codegen_flags: <defaults>
</compile_context>

<pallas_src>
import jax
import jax.numpy as jnp
from jax.experimental import pallas as pl
from jax.experimental.pallas import tpu as pltpu

SUBLANE = 8       # padded output feature rows (5 -> 8)
LANE = 128        # batch lanes per vreg
NEG_INF = -1e30   # softmax-safe logit padding (exp underflows to exactly 0)


def _sigmoid(x):
    # 1 / (1 + exp(-x)); exp and the approx reciprocal both use the EUP slot.
    return pl.reciprocal(1.0 + jnp.exp(-x), approx=True)


def mlp_kernel(x_ref, w1_ref, b1_ref, w2_ref, b2_ref, w3_ref, b3_ref, o_ref):
    # Feature-major layout: activations are (features, tb), batch on lanes.
    x = x_ref[...]                                               # (in, tb) bf16

    h1 = jnp.dot(w1_ref[...], x,
                 preferred_element_type=jnp.float32) + b1_ref[...]
    h1 = _sigmoid(h1)                                            # (32, tb) f32

    h2 = jnp.dot(w2_ref[...], h1.astype(jnp.bfloat16),
                 preferred_element_type=jnp.float32) + b2_ref[...]
    h2 = _sigmoid(h2)                                            # (16, tb) f32

    # TODO(synk): Dropout(p=0.3) is identity in eval mode; training-mode RNG
    # masking is intentionally omitted to keep the forward deterministic.

    logits = jnp.dot(w3_ref[...], h2.astype(jnp.bfloat16),
                     preferred_element_type=jnp.float32) + b3_ref[...]  # (8, tb)

    # Softmax over the feature (sublane) axis.  Padded rows have zero weights
    # and a -1e30 bias, so exp() is exactly 0 for them after max subtraction.
    m = jnp.max(logits, axis=0, keepdims=True)
    e = jnp.exp(logits - m)
    denom = jnp.sum(e, axis=0, keepdims=True)
    # Exact division so output probabilities sum to 1 to f32 rounding.
    o_ref[...] = (e / denom).astype(o_ref.dtype)


def _round_up(a, m):
    return ((a + m - 1) // m) * m


def custom_classification_forward(x, params, *, block_cols=2048):
    w1, b1, w2, b2, w3, b3 = params        # w: (in, out), b: (1, out), f32
    batch, in_dim = x.shape
    h1_dim, h2_dim = w1.shape[1], w2.shape[1]
    out_dim = w3.shape[1]
    assert out_dim <= SUBLANE, "sublane padding assumes out_dim <= 8"

    # Feature-major weights; matmul operands in bf16 (MXU-native), biases f32.
    w1t = w1.T.astype(jnp.bfloat16)                                    # (32, 10)
    w2t = w2.T.astype(jnp.bfloat16)                                    # (16, 32)
    w3t = jnp.pad(w3.T, ((0, SUBLANE - out_dim), (0, 0))).astype(jnp.bfloat16)
    b1t = b1.T                                                         # (32, 1)
    b2t = b2.T                                                         # (16, 1)
    b3t = jnp.pad(b3.T, ((0, SUBLANE - out_dim), (0, 0)),
                  constant_values=NEG_INF)                             # (8, 1)

    # Batch maps to lanes: tiles are multiples of 128.  When there is more
    # than one lane-group of work, aim for >= 2 grid steps (v7x megacore).
    padded = _round_up(batch, LANE)
    if padded > LANE:
        tb = min(block_cols, _round_up(pl.cdiv(padded, 2), LANE))
    else:
        tb = LANE
    padded = _round_up(padded, tb)
    grid = (padded // tb,)

    xt = jnp.pad(x, ((0, padded - batch), (0, 0))).T.astype(jnp.bfloat16)

    # Weights/biases: full-array blocks with a constant block index -> stay
    # VMEM-resident across the whole grid (a few KiB total).
    resident = lambda a: pl.BlockSpec(a.shape, lambda i: (0, 0))

    cost = pl.CostEstimate(
        flops=2 * padded * (in_dim * h1_dim + h1_dim * h2_dim + h2_dim * SUBLANE),
        transcendentals=padded * (h1_dim + h2_dim + SUBLANE),
        bytes_accessed=(2 * padded * in_dim            # bf16 input stream
                        + 4 * padded * SUBLANE         # f32 output (8 rows)
                        + 2 * (w1t.size + w2t.size + w3t.size)
                        + 4 * (b1t.size + b2t.size + b3t.size)),
    )

    out_padded = pl.pallas_call(
        mlp_kernel,
        out_shape=jax.ShapeDtypeStruct((SUBLANE, padded), jnp.float32),
        grid=grid,
        in_specs=[pl.BlockSpec((in_dim, tb), lambda i: (0, i)),
                  resident(w1t), resident(b1t),
                  resident(w2t), resident(b2t),
                  resident(w3t), resident(b3t)],
        out_specs=pl.BlockSpec((SUBLANE, tb), lambda i: (0, i)),
        compiler_params=pltpu.CompilerParams(
            dimension_semantics=("parallel",)),
        cost_estimate=cost,
    )(xt, w1t, b1t, w2t, b2t, w3t, b3t)

    # Strip sublane/lane padding and return (batch, out_dim).
    return out_padded[:out_dim, :batch].T


def init_params(key, input_dim=10, hidden1_dim=32, hidden2_dim=16, output_dim=5):
    # Deterministic init mimicking torch.nn.Linear (uniform(-1/sqrt(fan_in), ...)).
    ks = jax.random.split(key, 6)

    def lin(kw, kb, fan_in, fan_out):
        bound = 1.0 / jnp.sqrt(fan_in)
        w = jax.random.uniform(kw, (fan_in, fan_out), jnp.float32, -bound, bound)
        b = jax.random.uniform(kb, (1, fan_out), jnp.float32, -bound, bound)
        return w, b

    w1, b1 = lin(ks[0], ks[1], input_dim, hidden1_dim)
    w2, b2 = lin(ks[2], ks[3], hidden1_dim, hidden2_dim)
    w3, b3 = lin(ks[4], ks[5], hidden2_dim, output_dim)
    return (w1, b1, w2, b2, w3, b3)


def reference_forward(x, params):
    w1, b1, w2, b2, w3, b3 = params
    h1 = jax.nn.sigmoid(x @ w1 + b1)
    h2 = jax.nn.sigmoid(h1 @ w2 + b2)
    logits = h2 @ w3 + b3
    return jax.nn.softmax(logits, axis=1)


if __name__ == "__main__":
    key = jax.random.PRNGKey(0)
    k_x, k_x2, k_p = jax.random.split(key, 3)

    input_dim = 10
    params = init_params(k_p, input_dim=input_dim)

    # Small shape consistent with the module: (batch=8, input_dim=10).
    x = jax.random.normal(k_x, (8, input_dim), dtype=jnp.float32)
    out = jax.block_until_ready(custom_classification_forward(x, params))
    ref = reference_forward(x, params)
    assert out.shape == (8, 5)
    # bf16 matmuls + approx-reciprocal sigmoid -> loose element tolerance vs
    # the f32 reference; the softmax normalization itself is exact.
    assert jnp.allclose(out, ref, atol=2e-2, rtol=2e-2)
    assert jnp.allclose(jnp.sum(out, axis=1), 1.0, atol=1e-4)

    # Multi-tile path: batch=300 -> padded to 512 lanes, 2 grid steps.
    x2 = jax.random.normal(k_x2, (300, input_dim), dtype=jnp.float32)
    out2 = jax.block_until_ready(custom_classification_forward(x2, params))
    ref2 = reference_forward(x2, params)
    assert out2.shape == (300, 5)
    assert jnp.allclose(out2, ref2, atol=2e-2, rtol=2e-2)
    assert jnp.allclose(jnp.sum(out2, axis=1), 1.0, atol=1e-4)

    print("KERNEL_OK")
</pallas_src>

<mosaic_0001>
module attributes {stable_mosaic.version = 11 : i64} {
  func.func @mlp_kernel(%arg0: i32, %arg1: memref<10x128xbf16, #tpu.memory_space<vmem>>, %arg2: memref<32x10xbf16, #tpu.memory_space<vmem>>, %arg3: memref<32x1xf32, #tpu.memory_space<vmem>>, %arg4: memref<16x32xbf16, #tpu.memory_space<vmem>>, %arg5: memref<16x1xf32, #tpu.memory_space<vmem>>, %arg6: memref<8x16xbf16, #tpu.memory_space<vmem>>, %arg7: memref<8x1xf32, #tpu.memory_space<vmem>>, %arg8: memref<8x128xf32, #tpu.memory_space<vmem>>) attributes {dimension_semantics = [#tpu.dimension_semantics<parallel>], iteration_bounds = array<i64: 1>, scalar_prefetch = 0 : i64, scratch_operands = 0 : i64, tpu.core_type = #tpu.core_type<tc>, window_params = [{transform_indices = @transform_0, window_bounds = array<i64: 10, 128>}, {pipeline_mode = #tpu.pipeline_mode<synchronous>, transform_indices = @transform_1, window_bounds = array<i64: 32, 10>}, {pipeline_mode = #tpu.pipeline_mode<synchronous>, transform_indices = @transform_2, window_bounds = array<i64: 32, 1>}, {pipeline_mode = #tpu.pipeline_mode<synchronous>, transform_indices = @transform_3, window_bounds = array<i64: 16, 32>}, {pipeline_mode = #tpu.pipeline_mode<synchronous>, transform_indices = @transform_4, window_bounds = array<i64: 16, 1>}, {pipeline_mode = #tpu.pipeline_mode<synchronous>, transform_indices = @transform_5, window_bounds = array<i64: 8, 16>}, {pipeline_mode = #tpu.pipeline_mode<synchronous>, transform_indices = @transform_6, window_bounds = array<i64: 8, 1>}, {transform_indices = @transform_7, window_bounds = array<i64: 8, 128>}]} {
    %c0 = arith.constant 0 : index
    %c0_0 = arith.constant 0 : index
    %0 = vector.load %arg1[%c0, %c0_0] : memref<10x128xbf16, #tpu.memory_space<vmem>>, vector<10x128xbf16>
    %c0_1 = arith.constant 0 : index
    %c0_2 = arith.constant 0 : index
    %1 = vector.load %arg2[%c0_1, %c0_2] : memref<32x10xbf16, #tpu.memory_space<vmem>>, vector<32x10xbf16>
    %cst = arith.constant dense<0.000000e+00> : vector<32x128xf32>
    %2 = tpu.matmul %1, %0, %cst {dimension_numbers = #tpu.dot_dimension_numbers<[1], [0], [0], [1], [0, 0, 1, 1], [], []>} : vector<32x10xbf16>, vector<10x128xbf16>, vector<32x128xf32> -> vector<32x128xf32>
    %c0_3 = arith.constant 0 : index
    %c0_4 = arith.constant 0 : index
    %3 = vector.load %arg3[%c0_3, %c0_4] : memref<32x1xf32, #tpu.memory_space<vmem>>, vector<32x1xf32>
    %4 = vector.broadcast %3 : vector<32x1xf32> to vector<32x128xf32>
    %5 = arith.addf %2, %4 : vector<32x128xf32>
    %cst_5 = arith.constant 0.000000e+00 : f32
    %6 = vector.broadcast %cst_5 : f32 to vector<32x128xf32>
    %7 = arith.subf %6, %5 : vector<32x128xf32>
    %8 = math.exp %7 : vector<32x128xf32>
    %cst_6 = arith.constant 1.000000e+00 : f32
    %9 = vector.broadcast %cst_6 : f32 to vector<32x128xf32>
    %10 = arith.addf %9, %8 : vector<32x128xf32>
    %11 = tpu.reciprocal %10 {approx = true} : vector<32x128xf32> -> vector<32x128xf32>
    %c0_7 = arith.constant 0 : index
    %c0_8 = arith.constant 0 : index
    %12 = vector.load %arg4[%c0_7, %c0_8] : memref<16x32xbf16, #tpu.memory_space<vmem>>, vector<16x32xbf16>
    %13 = arith.truncf %11 : vector<32x128xf32> to vector<32x128xbf16>
    %cst_9 = arith.constant dense<0.000000e+00> : vector<16x128xf32>
    %14 = tpu.matmul %12, %13, %cst_9 {dimension_numbers = #tpu.dot_dimension_numbers<[1], [0], [0], [1], [0, 0, 1, 1], [], []>} : vector<16x32xbf16>, vector<32x128xbf16>, vector<16x128xf32> -> vector<16x128xf32>
    %c0_10 = arith.constant 0 : index
    %c0_11 = arith.constant 0 : index
    %15 = vector.load %arg5[%c0_10, %c0_11] : memref<16x1xf32, #tpu.memory_space<vmem>>, vector<16x1xf32>
    %16 = vector.broadcast %15 : vector<16x1xf32> to vector<16x128xf32>
    %17 = arith.addf %14, %16 : vector<16x128xf32>
    %cst_12 = arith.constant 0.000000e+00 : f32
    %18 = vector.broadcast %cst_12 : f32 to vector<16x128xf32>
    %19 = arith.subf %18, %17 : vector<16x128xf32>
    %20 = math.exp %19 : vector<16x128xf32>
    %cst_13 = arith.constant 1.000000e+00 : f32
    %21 = vector.broadcast %cst_13 : f32 to vector<16x128xf32>
    %22 = arith.addf %21, %20 : vector<16x128xf32>
    %23 = tpu.reciprocal %22 {approx = true} : vector<16x128xf32> -> vector<16x128xf32>
    %c0_14 = arith.constant 0 : index
    %c0_15 = arith.constant 0 : index
    %24 = vector.load %arg6[%c0_14, %c0_15] : memref<8x16xbf16, #tpu.memory_space<vmem>>, vector<8x16xbf16>
    %25 = arith.truncf %23 : vector<16x128xf32> to vector<16x128xbf16>
    %cst_16 = arith.constant dense<0.000000e+00> : vector<8x128xf32>
    %26 = tpu.matmul %24, %25, %cst_16 {dimension_numbers = #tpu.dot_dimension_numbers<[1], [0], [0], [1], [0, 0, 1, 1], [], []>} : vector<8x16xbf16>, vector<16x128xbf16>, vector<8x128xf32> -> vector<8x128xf32>
    %c0_17 = arith.constant 0 : index
    %c0_18 = arith.constant 0 : index
    %27 = vector.load %arg7[%c0_17, %c0_18] : memref<8x1xf32, #tpu.memory_space<vmem>>, vector<8x1xf32>
    %28 = vector.broadcast %27 : vector<8x1xf32> to vector<8x128xf32>
    %29 = arith.addf %26, %28 : vector<8x128xf32>
    %cst_19 = arith.constant dense<0xFF800000> : vector<128xf32>
    %30 = vector.multi_reduction <maximumf>, %29, %cst_19 [0] : vector<8x128xf32> to vector<128xf32>
    %31 = vector.shape_cast %30 : vector<128xf32> to vector<1x128xf32>
    %32 = vector.broadcast %31 : vector<1x128xf32> to vector<8x128xf32>
    %33 = arith.subf %29, %32 : vector<8x128xf32>
    %34 = math.exp %33 : vector<8x128xf32>
    %cst_20 = arith.constant dense<0.000000e+00> : vector<128xf32>
    %35 = vector.multi_reduction <add>, %34, %cst_20 [0] : vector<8x128xf32> to vector<128xf32>
    %36 = vector.shape_cast %35 : vector<128xf32> to vector<1x128xf32>
    %37 = vector.broadcast %36 : vector<1x128xf32> to vector<8x128xf32>
    %38 = arith.divf %34, %37 : vector<8x128xf32>
    %c0_21 = arith.constant 0 : index
    %c0_22 = arith.constant 0 : index
    %39 = vector.load %arg8[%c0_21, %c0_22] : memref<8x128xf32, #tpu.memory_space<vmem>>, vector<8x128xf32>
    tpu.vector_store %arg8[%c0_21, %c0_22], %38 {strides = array<i32>} : memref<8x128xf32, #tpu.memory_space<vmem>>, vector<8x128xf32>,
    return
  }
  func.func @transform_0(%arg0: i32) -> (i32, i32) {
    %c0_i32 = arith.constant 0 : i32
    %c0_i32_0 = arith.constant 0 : i32
    return %c0_i32, %arg0 : i32, i32
  }
  func.func @transform_1(%arg0: i32) -> (i32, i32) {
    %c0_i32 = arith.constant 0 : i32
    %c0_i32_0 = arith.constant 0 : i32
    %c0_i32_1 = arith.constant 0 : i32
    return %c0_i32, %c0_i32_0 : i32, i32
  }
  func.func @transform_2(%arg0: i32) -> (i32, i32) {
    %c0_i32 = arith.constant 0 : i32
    %c0_i32_0 = arith.constant 0 : i32
    %c0_i32_1 = arith.constant 0 : i32
    return %c0_i32, %c0_i32_0 : i32, i32
  }
  func.func @transform_3(%arg0: i32) -> (i32, i32) {
    %c0_i32 = arith.constant 0 : i32
    %c0_i32_0 = arith.constant 0 : i32
    %c0_i32_1 = arith.constant 0 : i32
    return %c0_i32, %c0_i32_0 : i32, i32
  }
  func.func @transform_4(%arg0: i32) -> (i32, i32) {
    %c0_i32 = arith.constant 0 : i32
    %c0_i32_0 = arith.constant 0 : i32
    %c0_i32_1 = arith.constant 0 : i32
    return %c0_i32, %c0_i32_0 : i32, i32
  }
  func.func @transform_5(%arg0: i32) -> (i32, i32) {
    %c0_i32 = arith.constant 0 : i32
    %c0_i32_0 = arith.constant 0 : i32
    %c0_i32_1 = arith.constant 0 : i32
    return %c0_i32, %c0_i32_0 : i32, i32
  }
  func.func @transform_6(%arg0: i32) -> (i32, i32) {
    %c0_i32 = arith.constant 0 : i32
    %c0_i32_0 = arith.constant 0 : i32
    %c0_i32_1 = arith.constant 0 : i32
    return %c0_i32, %c0_i32_0 : i32, i32
  }
  func.func @transform_7(%arg0: i32) -> (i32, i32) {
    %c0_i32 = arith.constant 0 : i32
    %c0_i32_0 = arith.constant 0 : i32
    return %c0_i32, %arg0 : i32, i32
  }
}

</mosaic_0001>

<bundles_post_ra>
// kernel: tpu_custom_call.1
= control target key start
LH: loop header
LB: loop body
LE: loop exit
PB: predicated region body
PF: predicated region fallthrough
CT: control target
= control target key end

     0   :  { %vm80_vm0 = vcmask 1044480   ;;  %v328_v3 = vmov 0   ;;  %s412_s0 = inlined_call_operand.vmem [shape: bf16[10,128], index: 0, kind: input, shape index: {}]   ;;  %s413_s1 = inlined_call_operand.vmem [shape: bf16[32,10], index: 1, kind: input, shape index: {}]   ;;  %s414_s2 = inlined_call_operand.vmem [shape: f32[32,1], index: 2, kind: input, shape index: {}]   ;;  %s415_s3 = inlined_call_operand.vmem [shape: bf16[16,32], index: 3, kind: input, shape index: {}]   ;;  %s416_s4 = inlined_call_operand.vmem [shape: f32[16,1], index: 4, kind: input, shape index: {}]   ;;  %s417_s5 = inlined_call_operand.vmem [shape: bf16[8,16], index: 5, kind: input, shape index: {}]   ;;  %s418_s6 = inlined_call_operand.vmem [shape: f32[8,1], index: 6, kind: input, shape index: {}]   ;;  %s419_s7 = inlined_call_operand.hbm [shape: f32[8,128], index: 7, kind: output, shape index: {}]  }
   0x1   :  { %v254_v0 = vld [vmem:[%s412_s0] sm:$0xf]  ;;  %v264_v1 = vld [vmem:[%s412_s0] sm:$0x10]  ;;  %271 = vset.pattern.permute.xlu0 %v328_v3  ;;  %v36_v4 = vld [vmem:[%s414_s2 + $0x10] sm:$0xff]  ;;  %272 = vset.pattern.permute.xlu1 %v328_v3 }
   0x2   :  { %v255_v2 = vor.u32 %v264_v1, %v254_v0  ;;  %50 = vperm.xlu0 %271, %v36_v4   ;;  %v34_v5 = vld [vmem:[%s414_s2] sm:$0xff]  ;;  %273 = vset.pattern.permute.xlu2 %v328_v3  ;;  %v266_v7 = vld [vmem:[%s413_s1 + $0x8] sm:$0xff] }
   0x3   :  { %v265_v8 = vld [vmem:[%s413_s1] sm:$0xff]  ;;  %40 = vperm.xlu1 %272, %v34_v5  }
   0x4   :  { %v82_v6 = vsel %vm80_vm0, %v255_v2, 0 }
   0x5   :  { %12 = vsyncpa [#allocation3], 0  ;;  %268 = vmatpush.bf16.msra.mxu3 %v82_v6  ;;  %91 = vmatpush.bf16.msra.mxu0 %v82_v6  ;;  %vm73_vm1 = vcmask 80896   ;;  %v37_v9 = vld [vmem:[%s414_s2 + $0x18] sm:$0xff]  ;;  %v35_v10 = vld [vmem:[%s414_s2 + $0x8] sm:$0xff]  ;;  %vm144_vm2 = vcmask 261120  }
   0x6   :  { %v174_v11 = vld [vmem:[%s418_s6] sm:$0xff]  ;;  %v128_v33 = vld [vmem:[%s416_s4 + $0x8] sm:$0xff]  ;;  %vm180_vm3 = vcmask 130048   ;;  %s235_s24 = sshll.u32 %s419_s7, 4  ;;  %s236_s24 = int_to_ptr.hbm [resolvable:$true] %s235_s24 }
   0x7   :  { %v127_v28 = vld [vmem:[%s416_s4] sm:$0xff] }
   0x8   :  { %257 = vmatmul.msk.bf16.vlgmr.msra.gmra.mxu3 %vm73_vm1, %v266_v7  ;;  %256 = vmatmul.msk.bf16.vlgmr.msra.gmra.mxu0 %vm73_vm1, %v265_v8  ;;  %v267_v48 = vld [vmem:[%s415_s3] sm:$0xff] }
   0x9   :  { %131 = vperm.xlu2 %273, %v127_v28   ;;  %v172_v2 = vld [vmem:[%s417_s5] sm:$0xf]  ;;  %s329_s5 = smov [#allocation2]  }
   0xa   :  { %55 = vperm.xlu0 %271, %v37_v9   ;;  %s233_s21 = sshll.u32 %s329_s5, 4  ;;  %s234_s21 = int_to_ptr.vmem [resolvable:$true] %s233_s21 }
   0xb   :  { %45 = vperm.xlu1 %272, %v35_v10  }
  0x11   :  { %136 = vperm.xlu2 %273, %v128_v33  }
  0x12   :  { %177 = vperm.xlu0 %271, %v174_v11  }
  0x63   :  { %v132_v49 = vpop.permute.xlu2 %131 }
  0x6b   :  { %v137_v54 = vpop.permute.xlu2 %136 }
  0x74   :  { %v51_v14 = vpop.permute.xlu0 %50 }
  0x75   :  { %v41_v12 = vpop.permute.xlu1 %40 }
  0x7c   :  { %v56_v25 = vpop.permute.xlu0 %55 }
  0x7d   :  { %v46_v17 = vpop.permute.xlu1 %45 }
  0x84   :  { %v178_v3 = vpop.permute.xlu0 %177 }
  0x85   :  { %v93_v13 = vpop.f32.mrf.mxu0 }
  0x86   :  { %v94_v15 = vadd.f32 %v93_v13, %v41_v12 }
  0x88   :  { %v103_v22 = vsub.f32 0.0, %v94_v15 }
  0x8a   :  { %v107_v26 = vmul.f32 1.442695, %v103_v22 }
  0x8b   :  { %v98_v16 = vpop.f32.mrf.mxu3 }
  0x8c   :  { %v99_v18 = vadd.f32 %v98_v16, %v51_v14 }
  0x8d   :  { %v95_v19 = vpop.f32.mrf.mxu0 }
  0x8e   :  { %v105_v20 = vsub.f32 0.0, %v99_v18  ;;  %v96_v21 = vadd.f32 %v95_v19, %v46_v17 }
  0x90   :  { %v104_v23 = vsub.f32 0.0, %v96_v21  ;;  %v111_v24 = vmul.f32 1.442695, %v105_v20 }
  0x92   :  { %v109_v29 = vmul.f32 1.442695, %v104_v23  ;;  %274 = vpow2.f32 %v111_v24 }
  0x93   :  { %v100_v27 = vpop.f32.mrf.mxu3  ;;  %276 = vpow2.f32 %v107_v26 }
  0x94   :  { %v101_v30 = vadd.f32 %v100_v27, %v56_v25  ;;  %278 = vpow2.f32 %v109_v29 }
  0x96   :  { %v106_v31 = vsub.f32 0.0, %v101_v30 }
  0x98   :  { %v113_v32 = vmul.f32 1.442695, %v106_v31  ;;  %v275_v34 = vpop.eup %274 }
  0x99   :  { %v277_v35 = vpop.eup %276  ;;  %v117_v37 = vadd.f32 1.0, %v275_v34 }
  0x9a   :  { %280 = vpow2.f32 %v113_v32  ;;  %v279_v36 = vpop.eup %278  ;;  %v115_v39 = vadd.f32 1.0, %v277_v35 }
  0x9b   :  { %v116_v40 = vadd.f32 1.0, %v279_v36  ;;  %282 = vrcp.f32 %v117_v37 }
  0xa0   :  { %v281_v38 = vpop.eup %280 }
  0xa1   :  { %v118_v41 = vadd.f32 1.0, %v281_v38  ;;  %v283_v42 = vpop.eup %282 }
  0xa3   :  { %284 = vrcp.f32 %v118_v41 }
  0xa4   :  { %286 = vrcp.f32 %v115_v39 }
  0xa5   :  { %288 = vrcp.f32 %v116_v40 }
  0xa9   :  { %v285_v43 = vpop.eup %284 }
  0xaa   :  { %v287_v44 = vpop.eup %286  ;;  %v126_v45 = vpack.c.bf16 %v285_v43, %v283_v42 }
  0xab   :  { %v289_v46 = vpop.eup %288 }
  0xac   :  { %154 = vmatpush.bf16.msra.mxu1 %v126_v45  ;;  %v125_v47 = vpack.c.bf16 %v289_v46, %v287_v44 }
  0xb0   :  { %155 = vmatpush.bf16.msra.mxu1 %v125_v47 }
  0xb3   :  { %262 = vmatmul.msk.bf16.vlgmr.msra.gmra.mxu1 %vm144_vm2, %v267_v48 }
 0x130   :  { %v157_v50 = vpop.f32.mrf.mxu1 }
 0x131   :  { %v158_v51 = vadd.f32 %v157_v50, %v132_v49 }
 0x133   :  { %v162_v52 = vsub.f32 0.0, %v158_v51 }
 0x135   :  { %v164_v53 = vmul.f32 1.442695, %v162_v52 }
 0x137   :  { %290 = vpow2.f32 %v164_v53 }
 0x138   :  { %v159_v55 = vpop.f32.mrf.mxu1 }
 0x139   :  { %v160_v56 = vadd.f32 %v159_v55, %v137_v54 }
 0x13b   :  { %v163_v57 = vsub.f32 0.0, %v160_v56 }
 0x13d   :  { %v166_v58 = vmul.f32 1.442695, %v163_v57  ;;  %v291_v59 = vpop.eup %290 }
 0x13e   :  { %v168_v60 = vadd.f32 1.0, %v291_v59 }
 0x13f   :  { %292 = vpow2.f32 %v166_v58 }
 0x140   :  { %294 = vrcp.f32 %v168_v60 }
 0x145   :  { %v293_v61 = vpop.eup %292 }
 0x146   :  { %v169_v62 = vadd.f32 1.0, %v293_v61  ;;  %v295_v63 = vpop.eup %294 }
 0x148   :  { %296 = vrcp.f32 %v169_v62 }
 0x14e   :  { %v297_v0 = vpop.eup %296 }
 0x14f   :  { %v173_v1 = vpack.c.bf16 %v297_v0, %v295_v63 }
 0x151   :  { %191 = vmatpush.bf16.msra.mxu2 %v173_v1 }
 0x154   :  { %263 = vmatmul.msk.bf16.vlgmr.msra.gmra.mxu2 %vm180_vm3, %v172_v2 }
 0x1d7   :  { %v193_v4 = vpop.f32.mrf.mxu2 }
 0x1d8   :  { %v194_v5 = vadd.f32 %v193_v4, %v178_v3 }
 0x1da   :  { %v197_v6 = vrot.slane %v194_v5, 4 }
 0x1dc   :  { %v198_v7 = vmax.f32 %v194_v5, %v197_v6 }
 0x1de   :  { %v199_v8 = vrot.slane %v198_v7, 2 }
 0x1df   :  { %v195_v9 = vpop.f32.mrf.mxu2 }
 0x1e0   :  { %v200_v10 = vmax.f32 %v198_v7, %v199_v8 }
 0x1e2   :  { %v201_v11 = vrot.slane %v200_v10, 1 }
 0x1e4   :  { %v202_v12 = vmax.f32 %v200_v10, %v201_v11 }
 0x1e6   :  { %v203_v13 = vsub.f32 %v194_v5, %v202_v12 }
 0x1e8   :  { %v204_v14 = vmul.f32 1.442695, %v203_v13 }
 0x1ea   :  { %298 = vpow2.f32 %v204_v14 }
 0x1f0   :  { %v299_v15 = vpop.eup %298 }
 0x1f1   :  { %v206_v16 = vrot.slane %v299_v15, 4 }
 0x1f3   :  { %v207_v17 = vadd.f32 %v299_v15, %v206_v16 }
 0x1f5   :  { %v208_v18 = vrot.slane %v207_v17, 2 }
 0x1f7   :  { %v209_v19 = vadd.f32 %v208_v18, %v207_v17 }
 0x1f9   :  { %v210_v20 = vrot.slane %v209_v19, 1 }
 0x1fb   :  { %v211_v21 = vadd.f32 %v210_v20, %v209_v19 }
 0x1fd   :  { %300 = vrcp.f32 %v211_v21  ;;  %v223_v25 = vand.u32 2147483648, %v211_v21  ;;  %v221_v27 = vand.u32 2147483647, %v211_v21  ;;  %vm217_vm5 = vweird.f32 %v211_v21 }
 0x1ff   :  { %v224_v29 = vor.u32 1.1754944e-38, %v223_v25  ;;  %vm222_vm7 = vcmp.eq.f32.partialorder %v221_v27, 8.507059e+37 }
 0x203   :  { %v301_v22 = vpop.eup %300 }
 0x204   :  { %v213_v23 = vmul.f32 %v301_v22, %v211_v21  ;;  %vm218_vm4 = vweird.f32 %v301_v22 }
 0x205   :  { %vm219_vm6 = vmor %vm217_vm5, %vm218_vm4 }
 0x206   :  { %v214_v24 = vsub.f32 1.0, %v213_v23 }
 0x208   :  { %v215_v26 = vmul.f32 %v301_v22, %v214_v24 }
 0x20a   :  { %v216_v28 = vadd.f32 %v301_v22, %v215_v26 }
 0x20c   :  { %v220_v30 = vsel %vm219_vm6, %v301_v22, %v216_v28 }
 0x20d   :  { %v225_v31 = vsel %vm222_vm7, %v224_v29, %v220_v30 }
 0x20e   :  { %v226_v32 = vmul.f32 %v299_v15, %v225_v31 }
 0x210   :  { %227 = vst [vmem:[#allocation2] sm:$0xff] %v226_v32 }
 0x211   :  { %238 = dma.vmem_to_hbm [thread:$0]  %s234_s21, 128, %s236_s24, [#allocation3]  }
 0x212   :  { %326 = dma.done.wait [#allocation3], 128  }
 0x213   :  { %327 = vsyncadd [#allocation3], 4294967168 }
 0x214   :  { %243 = vsyncpa [#allocation3], 1 }

</bundles_post_ra>
